<compile_context>
chip_gen: v5e
topology: v5e:2x2
jax: 0.10.0
libtpu: 0.0.40
codegen_flags: <defaults>
</compile_context>

<pallas_src>
import functools

import jax
import jax.numpy as jnp
from jax.experimental import pallas as pl
from jax.experimental.pallas import tpu as pltpu

F_IN = 120          # true feature width
F_PAD = 128         # lane-padded feature width
H1 = 60             # hidden width (encoder L1 out / decoder L4 in)


def _round_up(n, m):
    return ((n + m - 1) // m) * m


def autoencoder_kernel(x_ref, w1_ref, b1_ref, w23_ref, b23_ref, w4_ref, b4_ref,
                       out_ref):
    # x tile: (TB, 128); weights resident in VMEM.  All accumulation in f32,
    # bias-add / ReLU on the f32 accumulator (safe on v5e which lacks bf16 VPU).
    x = x_ref[...]

    # Encoder layer 1 + ReLU  (padded K=128 contraction, zero rows of W1 are inert)
    h1 = jnp.dot(x, w1_ref[...], preferred_element_type=jnp.float32) + b1_ref[...]
    h1 = jnp.maximum(h1, 0.0)

    # Fused encoder-L2 / decoder-L3 (no ReLU between them) + ReLU
    h2 = jnp.dot(h1.astype(w23_ref.dtype), w23_ref[...],
                 preferred_element_type=jnp.float32) + b23_ref[...]
    h2 = jnp.maximum(h2, 0.0)

    # Decoder layer 4 (output lane-padded to 128)
    y = jnp.dot(h2.astype(w4_ref.dtype), w4_ref[...],
                preferred_element_type=jnp.float32) + b4_ref[...]

    out_ref[...] = y.astype(out_ref.dtype)


@functools.partial(jax.jit, static_argnames=("compute_dtype", "tb"))
def autoencoder_forward(x, params, *, compute_dtype=jnp.float32, tb=1024):
    """x: (B, 120) float32; params: dict of (in,out) weights and (1,out) biases.

    Returns (B, 120) float32, numerically matching the PyTorch module
    (up to fp rounding from the layer-2/3 fusion and optional bf16 compute).
    """
    B, F = x.shape
    assert F == F_IN

    # ---- parameter prep (plain XLA, done once under jit) -------------------
    w1, b1 = params["w1"], params["b1"]          # (120, 60), (1, 60)
    w2, b2 = params["w2"], params["b2"]          # (60, 30),  (1, 30)
    w3, b3 = params["w3"], params["b3"]          # (30, 60),  (1, 60)
    w4, b4 = params["w4"], params["b4"]          # (60, 120), (1, 120)

    # Fuse L2/L3 (no ReLU in between):  z@W3 + b3 = h1@(W2@W3) + (b2@W3 + b3)
    w23 = jnp.dot(w2, w3, preferred_element_type=jnp.float32)        # (60, 60)
    b23 = jnp.dot(b2, w3, preferred_element_type=jnp.float32) + b3   # (1, 60)

    # Lane-pad the I/O-facing tensors to 128.
    w1p = jnp.pad(w1, ((0, F_PAD - F_IN), (0, 0)))                   # (128, 60)
    w4p = jnp.pad(w4, ((0, 0), (0, F_PAD - F_IN)))                   # (60, 128)
    b4p = jnp.pad(b4, ((0, 0), (0, F_PAD - F_IN)))                   # (1, 128)

    # Batch tile: multiple of 8 sublanes; shrink for tiny batches.
    tb_eff = _round_up(min(tb, _round_up(B, 8)), 8)
    Bp = _round_up(B, tb_eff)
    n_tiles = Bp // tb_eff

    xp = jnp.pad(x, ((0, Bp - B), (0, F_PAD - F_IN)))                # (Bp, 128)

    # Optional bf16 activations/weights (f32 accumulate); biases stay f32.
    xp = xp.astype(compute_dtype)
    w1p = w1p.astype(compute_dtype)
    w23c = w23.astype(compute_dtype)
    w4p = w4p.astype(compute_dtype)
    b1f = b1.astype(jnp.float32)
    b23f = b23.astype(jnp.float32)
    b4f = b4p.astype(jnp.float32)

    io_bytes = jnp.dtype(compute_dtype).itemsize
    param_bytes = (w1p.size + w23c.size + w4p.size) * io_bytes + \
                  (b1f.size + b23f.size + b4f.size) * 4
    cost = pl.CostEstimate(
        flops=2 * Bp * (F_PAD * H1 + H1 * H1 + H1 * F_PAD),
        transcendentals=0,
        bytes_accessed=2 * Bp * F_PAD * io_bytes + param_bytes,
    )

    def const_spec(shape):
        return pl.BlockSpec(shape, lambda i: tuple(0 for _ in shape))

    out = pl.pallas_call(
        autoencoder_kernel,
        out_shape=jax.ShapeDtypeStruct((Bp, F_PAD), compute_dtype),
        grid=(n_tiles,),
        in_specs=[
            pl.BlockSpec((tb_eff, F_PAD), lambda i: (i, 0)),   # x tile (pipelined)
            const_spec(w1p.shape), const_spec(b1f.shape),      # params stay resident
            const_spec(w23c.shape), const_spec(b23f.shape),
            const_spec(w4p.shape), const_spec(b4f.shape),
        ],
        out_specs=pl.BlockSpec((tb_eff, F_PAD), lambda i: (i, 0)),
        compiler_params=pltpu.CompilerParams(
            dimension_semantics=("parallel",),
        ),
        cost_estimate=cost,
    )(xp, w1p, b1f, w23c, b23f, w4p, b4f)

    return out[:B, :F_IN].astype(x.dtype)


def init_params(key):
    """Deterministic init mimicking PyTorch Linear default (U[-1/sqrt(in), 1/sqrt(in)]).
    Weights stored as (in, out) = transpose of PyTorch's (out, in)."""
    dims = [(120, 60), (60, 30), (30, 60), (60, 120)]
    params = {}
    for i, (fan_in, fan_out) in enumerate(dims, start=1):
        key, kw, kb = jax.random.split(key, 3)
        bound = 1.0 / jnp.sqrt(jnp.float32(fan_in))
        params[f"w{i}"] = jax.random.uniform(
            kw, (fan_in, fan_out), jnp.float32, minval=-bound, maxval=bound)
        params[f"b{i}"] = jax.random.uniform(
            kb, (1, fan_out), jnp.float32, minval=-bound, maxval=bound)
    return params


def reference_forward(x, p):
    h1 = jnp.maximum(x @ p["w1"] + p["b1"], 0.0)
    z = h1 @ p["w2"] + p["b2"]
    h2 = jnp.maximum(z @ p["w3"] + p["b3"], 0.0)
    return h2 @ p["w4"] + p["b4"]


if __name__ == "__main__":
    key = jax.random.PRNGKey(0)
    key, kx = jax.random.split(key)

    # NOTE: at B=8 the per-call overhead dominates; real deployments should
    # batch >= 512 rows per call (the kernel tiles/pipelines them automatically).
    B = 8
    x = jax.random.normal(kx, (B, 120), jnp.float32)
    params = init_params(key)
    ref = reference_forward(x, params)

    # f32 path (tight tolerance; only fp-rounding delta from the L2/L3 fusion)
    out = jax.block_until_ready(autoencoder_forward(x, params))
    assert out.shape == (B, 120), out.shape
    assert jnp.allclose(out, ref, atol=1e-4, rtol=1e-4), "mismatch vs JAX reference (f32)"

    # bf16 activation path (HBM-bound large-batch config); loose tolerance.
    out_bf16 = jax.block_until_ready(
        autoencoder_forward(x, params, compute_dtype=jnp.bfloat16))
    assert out_bf16.shape == (B, 120)
    assert bool(jnp.all(jnp.isfinite(out_bf16)))
    assert float(jnp.max(jnp.abs(out_bf16 - ref))) < 0.15, "bf16 path diverged"

    print("KERNEL_OK")
</pallas_src>

<mosaic_0001>
module attributes {stable_mosaic.version = 11 : i64} {
  func.func @autoencoder_kernel(%arg0: i32, %arg1: memref<8x128xf32, #tpu.memory_space<vmem>>, %arg2: memref<128x60xf32, #tpu.memory_space<vmem>>, %arg3: memref<1x60xf32, #tpu.memory_space<vmem>>, %arg4: memref<60x60xf32, #tpu.memory_space<vmem>>, %arg5: memref<1x60xf32, #tpu.memory_space<vmem>>, %arg6: memref<60x128xf32, #tpu.memory_space<vmem>>, %arg7: memref<1x128xf32, #tpu.memory_space<vmem>>, %arg8: memref<8x128xf32, #tpu.memory_space<vmem>>) attributes {dimension_semantics = [#tpu.dimension_semantics<parallel>], iteration_bounds = array<i64: 1>, scalar_prefetch = 0 : i64, scratch_operands = 0 : i64, tpu.core_type = #tpu.core_type<tc>, window_params = [{transform_indices = @transform_0, window_bounds = array<i64: 8, 128>}, {pipeline_mode = #tpu.pipeline_mode<synchronous>, transform_indices = @transform_1, window_bounds = array<i64: 128, 60>}, {pipeline_mode = #tpu.pipeline_mode<synchronous>, transform_indices = @transform_2, window_bounds = array<i64: 1, 60>}, {pipeline_mode = #tpu.pipeline_mode<synchronous>, transform_indices = @transform_3, window_bounds = array<i64: 60, 60>}, {pipeline_mode = #tpu.pipeline_mode<synchronous>, transform_indices = @transform_4, window_bounds = array<i64: 1, 60>}, {pipeline_mode = #tpu.pipeline_mode<synchronous>, transform_indices = @transform_5, window_bounds = array<i64: 60, 128>}, {pipeline_mode = #tpu.pipeline_mode<synchronous>, transform_indices = @transform_6, window_bounds = array<i64: 1, 128>}, {transform_indices = @transform_7, window_bounds = array<i64: 8, 128>}]} {
    %c0 = arith.constant 0 : index
    %c0_0 = arith.constant 0 : index
    %0 = vector.load %arg1[%c0, %c0_0] : memref<8x128xf32, #tpu.memory_space<vmem>>, vector<8x128xf32>
    %c0_1 = arith.constant 0 : index
    %c0_2 = arith.constant 0 : index
    %1 = vector.load %arg2[%c0_1, %c0_2] : memref<128x60xf32, #tpu.memory_space<vmem>>, vector<128x60xf32>
    %cst = arith.constant dense<0.000000e+00> : vector<8x60xf32>
    %2 = tpu.matmul %0, %1, %cst {dimension_numbers = #tpu.dot_dimension_numbers<[1], [0], [0], [1], [0, 0, 1, 1], [], []>} : vector<8x128xf32>, vector<128x60xf32>, vector<8x60xf32> -> vector<8x60xf32>
    %c0_3 = arith.constant 0 : index
    %c0_4 = arith.constant 0 : index
    %3 = vector.load %arg3[%c0_3, %c0_4] : memref<1x60xf32, #tpu.memory_space<vmem>>, vector<1x60xf32>
    %4 = vector.broadcast %3 : vector<1x60xf32> to vector<8x60xf32>
    %5 = arith.addf %2, %4 : vector<8x60xf32>
    %cst_5 = arith.constant 0.000000e+00 : f32
    %6 = vector.broadcast %cst_5 : f32 to vector<8x60xf32>
    %7 = arith.maximumf %5, %6 : vector<8x60xf32>
    %c0_6 = arith.constant 0 : index
    %c0_7 = arith.constant 0 : index
    %8 = vector.load %arg4[%c0_6, %c0_7] : memref<60x60xf32, #tpu.memory_space<vmem>>, vector<60x60xf32>
    %cst_8 = arith.constant dense<0.000000e+00> : vector<8x60xf32>
    %9 = tpu.matmul %7, %8, %cst_8 {dimension_numbers = #tpu.dot_dimension_numbers<[1], [0], [0], [1], [0, 0, 1, 1], [], []>} : vector<8x60xf32>, vector<60x60xf32>, vector<8x60xf32> -> vector<8x60xf32>
    %c0_9 = arith.constant 0 : index
    %c0_10 = arith.constant 0 : index
    %10 = vector.load %arg5[%c0_9, %c0_10] : memref<1x60xf32, #tpu.memory_space<vmem>>, vector<1x60xf32>
    %11 = vector.broadcast %10 : vector<1x60xf32> to vector<8x60xf32>
    %12 = arith.addf %9, %11 : vector<8x60xf32>
    %cst_11 = arith.constant 0.000000e+00 : f32
    %13 = vector.broadcast %cst_11 : f32 to vector<8x60xf32>
    %14 = arith.maximumf %12, %13 : vector<8x60xf32>
    %c0_12 = arith.constant 0 : index
    %c0_13 = arith.constant 0 : index
    %15 = vector.load %arg6[%c0_12, %c0_13] : memref<60x128xf32, #tpu.memory_space<vmem>>, vector<60x128xf32>
    %cst_14 = arith.constant dense<0.000000e+00> : vector<8x128xf32>
    %16 = tpu.matmul %14, %15, %cst_14 {dimension_numbers = #tpu.dot_dimension_numbers<[1], [0], [0], [1], [0, 0, 1, 1], [], []>} : vector<8x60xf32>, vector<60x128xf32>, vector<8x128xf32> -> vector<8x128xf32>
    %c0_15 = arith.constant 0 : index
    %c0_16 = arith.constant 0 : index
    %17 = vector.load %arg7[%c0_15, %c0_16] : memref<1x128xf32, #tpu.memory_space<vmem>>, vector<1x128xf32>
    %18 = vector.broadcast %17 : vector<1x128xf32> to vector<8x128xf32>
    %19 = arith.addf %16, %18 : vector<8x128xf32>
    %c0_17 = arith.constant 0 : index
    %c0_18 = arith.constant 0 : index
    %20 = vector.load %arg8[%c0_17, %c0_18] : memref<8x128xf32, #tpu.memory_space<vmem>>, vector<8x128xf32>
    tpu.vector_store %arg8[%c0_17, %c0_18], %19 {strides = array<i32>} : memref<8x128xf32, #tpu.memory_space<vmem>>, vector<8x128xf32>,
    return
  }
  func.func @transform_0(%arg0: i32) -> (i32, i32) {
    %c0_i32 = arith.constant 0 : i32
    %c0_i32_0 = arith.constant 0 : i32
    return %arg0, %c0_i32 : i32, i32
  }
  func.func @transform_1(%arg0: i32) -> (i32, i32) {
    %c0_i32 = arith.constant 0 : i32
    %c0_i32_0 = arith.constant 0 : i32
    %c0_i32_1 = arith.constant 0 : i32
    return %c0_i32, %c0_i32_0 : i32, i32
  }
  func.func @transform_2(%arg0: i32) -> (i32, i32) {
    %c0_i32 = arith.constant 0 : i32
    %c0_i32_0 = arith.constant 0 : i32
    %c0_i32_1 = arith.constant 0 : i32
    return %c0_i32, %c0_i32_0 : i32, i32
  }
  func.func @transform_3(%arg0: i32) -> (i32, i32) {
    %c0_i32 = arith.constant 0 : i32
    %c0_i32_0 = arith.constant 0 : i32
    %c0_i32_1 = arith.constant 0 : i32
    return %c0_i32, %c0_i32_0 : i32, i32
  }
  func.func @transform_4(%arg0: i32) -> (i32, i32) {
    %c0_i32 = arith.constant 0 : i32
    %c0_i32_0 = arith.constant 0 : i32
    %c0_i32_1 = arith.constant 0 : i32
    return %c0_i32, %c0_i32_0 : i32, i32
  }
  func.func @transform_5(%arg0: i32) -> (i32, i32) {
    %c0_i32 = arith.constant 0 : i32
    %c0_i32_0 = arith.constant 0 : i32
    %c0_i32_1 = arith.constant 0 : i32
    return %c0_i32, %c0_i32_0 : i32, i32
  }
  func.func @transform_6(%arg0: i32) -> (i32, i32) {
    %c0_i32 = arith.constant 0 : i32
    %c0_i32_0 = arith.constant 0 : i32
    %c0_i32_1 = arith.constant 0 : i32
    return %c0_i32, %c0_i32_0 : i32, i32
  }
  func.func @transform_7(%arg0: i32) -> (i32, i32) {
    %c0_i32 = arith.constant 0 : i32
    %c0_i32_0 = arith.constant 0 : i32
    return %arg0, %c0_i32 : i32, i32
  }
}

</mosaic_0001>

<bundles_post_ra>
// kernel: autoencoder_forward.1
= control target key start
LH: loop header
LB: loop body
LE: loop exit
PB: predicated region body
PF: predicated region fallthrough
CT: control target
= control target key end

     0   :  { %vm85_vm0 = vcmask 1043456   ;;  %s353_s0 = inlined_call_operand.vmem [shape: f32[8,128], index: 0, kind: input, shape index: {}]   ;;  %s354_s1 = inlined_call_operand.vmem [shape: f32[128,60], index: 1, kind: input, shape index: {}]   ;;  %s355_s2 = inlined_call_operand.vmem [shape: f32[1,60], index: 2, kind: input, shape index: {}]   ;;  %s356_s3 = inlined_call_operand.vmem [shape: f32[60,60], index: 3, kind: input, shape index: {}]   ;;  %s357_s4 = inlined_call_operand.vmem [shape: f32[1,60], index: 4, kind: input, shape index: {}]   ;;  %s358_s5 = inlined_call_operand.vmem [shape: f32[60,128], index: 5, kind: input, shape index: {}]   ;;  %s359_s6 = inlined_call_operand.vmem [shape: f32[1,128], index: 6, kind: input, shape index: {}]   ;;  %s360_s7 = inlined_call_operand.hbm [shape: f32[8,128], index: 7, kind: output, shape index: {}]  }
   0x1   :  { %v43_v0 = vld [vmem:[%s354_s1 + $0x78] sm:$0xff]  ;;  %v42_v1 = vld [vmem:[%s354_s1 + $0x70] sm:$0xff]  ;;  %v41_v2 = vld [vmem:[%s354_s1 + $0x68] sm:$0xff] }
   0x2   :  { %48 = vmatpush.msra.mxu0 %v43_v0  ;;  %v40_v3 = vld [vmem:[%s354_s1 + $0x60] sm:$0xff]  ;;  %v76_v4 = vld [vmem:[%s356_s3 + $0x38] sm:$0xf]  ;;  %v75_v6 = vld [vmem:[%s356_s3 + $0x30] sm:$0xff] }
   0x3   :  { %v39_v5 = vld [vmem:[%s354_s1 + $0x58] sm:$0xff]  ;;  %165 = vmatpush.msk.msra.mxu1 %vm85_vm0, %v76_v4  ;;  %v38_v7 = vld [vmem:[%s354_s1 + $0x50] sm:$0xff]  ;;  %v74_v8 = vld [vmem:[%s356_s3 + $0x28] sm:$0xff] }
   0x4   :  { %49 = vmatpush.msra.mxu0 %v42_v1 }
   0x5   :  { %98 = vmatpush.msra.mxu1 %v75_v6 }
   0x6   :  { %50 = vmatpush.msra.mxu0 %v41_v2 }
   0x8   :  { %51 = vmatpush.msra.mxu0 %v40_v3 }
   0x9   :  { %12 = vsyncpa [#allocation3], 0  ;;  %v73_v9 = vld [vmem:[%s356_s3 + $0x20] sm:$0xff]  ;;  %v37_v10 = vld [vmem:[%s354_s1 + $0x48] sm:$0xff]  ;;  %99 = vmatpush.msra.mxu1 %v74_v8  ;;  %vm81_vm1 = vcmask 490496   ;;  %s199_s23 = smov [#allocation2]  }
   0xa   :  { %52 = vmatpush.msra.mxu0 %v39_v5  ;;  %v72_v11 = vld [vmem:[%s356_s3 + $0x18] sm:$0xff]  ;;  %v36_v12 = vld [vmem:[%s354_s1 + $0x40] sm:$0xff]  ;;  %v34_v14 = vld [vmem:[%s354_s1 + $0x30] sm:$0xff]  ;;  %s154_s24 = sshll.u32 %s199_s23, 4  ;;  %s156_s27 = sshll.u32 %s360_s7, 4  ;;  %s155_s24 = int_to_ptr.vmem [resolvable:$true] %s154_s24  ;;  %s157_s27 = int_to_ptr.hbm [resolvable:$true] %s156_s27 }
   0xb   :  { %100 = vmatpush.msra.mxu1 %v73_v9  ;;  %v35_v13 = vld [vmem:[%s354_s1 + $0x38] sm:$0xff]  ;;  %v33_v15 = vld [vmem:[%s354_s1 + $0x28] sm:$0xff]  ;;  %v32_v16 = vld [vmem:[%s354_s1 + $0x20] sm:$0xff] }
   0xc   :  { %53 = vmatpush.msra.mxu0 %v38_v7  ;;  %v31_v17 = vld [vmem:[%s354_s1 + $0x18] sm:$0xff]  ;;  %v30_v18 = vld [vmem:[%s354_s1 + $0x10] sm:$0xff]  ;;  %v29_v19 = vld [vmem:[%s354_s1 + $0x8] sm:$0xff] }
   0xd   :  { %101 = vmatpush.msra.mxu1 %v72_v11  ;;  %v28_v20 = vld [vmem:[%s354_s1] sm:$0xff]  ;;  %v71_v22 = vld [vmem:[%s356_s3 + $0x10] sm:$0xff]  ;;  %v70_v23 = vld [vmem:[%s356_s3 + $0x8] sm:$0xff] }
   0xe   :  { %54 = vmatpush.msra.mxu0 %v37_v10  ;;  %v27_v21 = vld [vmem:[%s353_s0] sm:$0xff]  ;;  %v117_v25 = vld [vmem:[%s358_s5 + $0x38] sm:$0xf]  ;;  %v116_v26 = vld [vmem:[%s358_s5 + $0x30] sm:$0xff] }
   0xf   :  { %102 = vmatpush.msra.mxu1 %v71_v22  ;;  %v69_v24 = vld [vmem:[%s356_s3] sm:$0xff]  ;;  %167 = vmatpush.msk.msra.mxu2 %vm85_vm0, %v117_v25  ;;  %v115_v27 = vld [vmem:[%s358_s5 + $0x28] sm:$0xff]  ;;  %v113_v29 = vld [vmem:[%s358_s5 + $0x18] sm:$0xff] }
  0x10   :  { %55 = vmatpush.msra.mxu0 %v36_v12  ;;  %v114_v28 = vld [vmem:[%s358_s5 + $0x20] sm:$0xff]  ;;  %v112_v34 = vld [vmem:[%s358_s5 + $0x10] sm:$0xff]  ;;  %v111_v35 = vld [vmem:[%s358_s5 + $0x8] sm:$0xff] }
  0x11   :  { %103 = vmatpush.msra.mxu1 %v70_v23  ;;  %137 = vmatpush.msra.mxu2 %v116_v26  ;;  %v170_v30 = vld [vmem:[%s355_s2] ss:$0 sm:$0xff] }
  0x12   :  { %56 = vmatpush.msra.mxu0 %v35_v13  ;;  %v110_v36 = vld [vmem:[%s358_s5] sm:$0xff] }
  0x13   :  { %104 = vmatpush.msra.mxu1 %v69_v24  ;;  %138 = vmatpush.msra.mxu2 %v115_v27  ;;  %v171_v37 = vld [vmem:[%s357_s4] ss:$0 sm:$0xff] }
  0x14   :  { %57 = vmatpush.msra.mxu0 %v34_v14  ;;  %v172_v41 = vld [vmem:[%s359_s6] ss:$0 sm:$0xff] }
  0x15   :  { %139 = vmatpush.msra.mxu2 %v114_v28 }
  0x16   :  { %58 = vmatpush.msra.mxu0 %v33_v15 }
  0x17   :  { %140 = vmatpush.msra.mxu2 %v113_v29 }
  0x18   :  { %59 = vmatpush.msra.mxu0 %v32_v16 }
  0x19   :  { %141 = vmatpush.msra.mxu2 %v112_v34 }
  0x1a   :  { %60 = vmatpush.msra.mxu0 %v31_v17 }
  0x1b   :  { %142 = vmatpush.msra.mxu2 %v111_v35 }
  0x1c   :  { %61 = vmatpush.msra.mxu0 %v30_v18 }
  0x1d   :  { %143 = vmatpush.msra.mxu2 %v110_v36 }
  0x1e   :  { %62 = vmatpush.msra.mxu0 %v29_v19 }
  0x20   :  { %63 = vmatpush.msra.mxu0 %v28_v20 }
  0x21   :  { %64 = vmatmul.f32.vlgmr.msra.gmra.mxu0 %v27_v21 }
  0x9e   :  { %v65_v31 = vpop.f32.mrf.mxu0 }
  0x9f   :  { %v66_v32 = vadd.f32 %v170_v30, %v65_v31 }
  0xa1   :  { %v68_v33 = vmax.f32 %v66_v32, 0.0 }
  0xa3   :  { %166 = vmatmul.msk.f32.vlgmr.msra.gmra.mxu1 %vm81_vm1, %v68_v33 }
 0x120   :  { %v106_v38 = vpop.f32.mrf.mxu1 }
 0x121   :  { %v107_v39 = vadd.f32 %v171_v37, %v106_v38 }
 0x123   :  { %v109_v40 = vmax.f32 %v107_v39, 0.0 }
 0x125   :  { %168 = vmatmul.msk.f32.vlgmr.msra.gmra.mxu2 %vm81_vm1, %v109_v40 }
 0x1a8   :  { %v145_v42 = vpop.f32.mrf.mxu2 }
 0x1a9   :  { %v146_v43 = vadd.f32 %v172_v41, %v145_v42 }
 0x1ab   :  { %148 = vst [vmem:[#allocation2] sm:$0xff] %v146_v43 }
 0x1ac   :  { %159 = dma.vmem_to_hbm [thread:$0]  %s155_s24, 128, %s157_s27, [#allocation3]  }
 0x1ad   :  { %197 = dma.done.wait [#allocation3], 128  }
 0x1ae   :  { %198 = vsyncadd [#allocation3], 4294967168 }
 0x1af   :  { %164 = vsyncpa [#allocation3], 1 }

</bundles_post_ra>
